<compile_context>
chip_gen: v5e
topology: v5e:2x2
jax: 0.10.0
libtpu: 0.0.40
codegen_flags: <defaults>
</compile_context>

<pallas_src>
import functools
import math

import jax
import jax.numpy as jnp
from jax.experimental import pallas as pl
from jax.experimental.pallas import tpu as pltpu


def _rowdot_kernel(a_ref, b_ref, sel_ref, o_ref):
    """Row-wise dot product via a single MXU selector matmul.

    a_ref/b_ref: (TILE, width) input tiles, width = fold * h.
    sel_ref:     (width, fold) constant block-diagonal ones selector; column k
                 selects lane segment [k*h, (k+1)*h).
    o_ref:       (TILE, fold); column k holds the dot product of original row
                 r*fold + k.
    """
    # Elementwise product on the VPU, accumulated in f32 (no low-precision
    # accumulation for bf16/fp8 inputs).
    prod = a_ref[...].astype(jnp.float32) * b_ref[...].astype(jnp.float32)
    # Per-segment reduction on the otherwise-idle MXU: one matmul + one store
    # instead of `fold` XLU reduces + `fold` masked 1-lane stores.
    acc = jnp.dot(prod, sel_ref[...], preferred_element_type=jnp.float32)
    o_ref[...] = acc.astype(o_ref.dtype)


def matrix_factorization(solutes_features: jax.Array,
                         solvents_features: jax.Array,
                         *,
                         vmem_input_budget_bytes: int = 12 << 20) -> jax.Array:
    assert solutes_features.shape == solvents_features.shape
    orig_shape = solutes_features.shape
    h = orig_shape[-1]
    n = math.prod(orig_shape[:-1]) if len(orig_shape) > 1 else 1

    dtype = solutes_features.dtype
    itemsize = jnp.dtype(dtype).itemsize
    # Dtype-aware sublane multiple (sub-32-bit dtypes pack along sublanes).
    if itemsize >= 4:
        sublane = 8
    elif itemsize == 2:
        sublane = 16
    else:
        sublane = 32

    a = solutes_features.reshape(n, h)
    b = solvents_features.reshape(n, h)

    # --- Lane folding for narrow feature dims (h < 128) -------------------
    # Fold `fold` consecutive rows into one 128-lane row so vregs are fully
    # occupied.  Pad n up to a multiple of fold (padded rows are dropped from
    # the output) instead of falling back to partial-lane occupancy.
    if h < 128 and 128 % h == 0:
        fold = 128 // h
    else:
        fold = 1
    pad_rows = (-n) % fold
    if pad_rows:
        a = jnp.pad(a, ((0, pad_rows), (0, 0)))
        b = jnp.pad(b, ((0, pad_rows), (0, 0)))
    n_padded = n + pad_rows
    rows, width = n_padded // fold, h * fold
    a2 = a.reshape(rows, width)      # free: row-major contiguous reshape
    b2 = b.reshape(rows, width)

    # Constant block-diagonal ones selector: sel[j, k] = 1 iff j // h == k.
    seg_of_lane = jnp.arange(width, dtype=jnp.int32) // h
    sel = (seg_of_lane[:, None] == jnp.arange(fold, dtype=jnp.int32)[None, :]
           ).astype(jnp.float32)

    # --- Row-tile size from a double-buffered VMEM budget ------------------
    width_lane_pad = -(-width // 128) * 128      # lane padding of input tiles
    width_sub_pad = -(-width // 8) * 8           # sublane padding of selector
    upcast_per_row = 0 if itemsize >= 4 else 2 * width_lane_pad * 4
    bytes_per_row = (
        2 * 2 * width_lane_pad * itemsize        # 2 inputs x 2 buffers
        + 2 * 128 * itemsize                     # output (fold padded to 128) x 2 buffers
        + width_lane_pad * 4                     # f32 product temporary
        + upcast_per_row                         # f32 upcast copies for bf16/int8
    )
    tile_budget = max(sublane,
                      (vmem_input_budget_bytes // bytes_per_row) // sublane * sublane)
    # Cap so the grid has >= ~8 steps (pipelining everywhere, 2-TC sharding on
    # v7x) with a floor so per-step overhead stays amortized.
    min_tile = 1024
    tile_split = -(-pl.cdiv(rows, 8) // sublane) * sublane
    tile = min(tile_budget, max(min_tile, tile_split))
    if tile >= rows:
        tile = rows                  # single full block (legal: equals array dim)
    grid = (pl.cdiv(rows, tile),)

    # Explicit VMEM limit from the true footprint, kept within v7x's 64 MiB/TC.
    in_bytes = 2 * 2 * tile * width_lane_pad * itemsize
    out_bytes = 2 * tile * 128 * itemsize
    sel_bytes = 2 * width_sub_pad * 128 * 4
    prod_bytes = tile * width_lane_pad * 4
    upcast_bytes = 0 if itemsize >= 4 else 2 * tile * width_lane_pad * 4
    footprint = in_bytes + out_bytes + sel_bytes + prod_bytes + upcast_bytes + (4 << 20)
    vmem_limit = int(min(48 << 20, max(16 << 20, footprint)))

    out = pl.pallas_call(
        _rowdot_kernel,
        out_shape=jax.ShapeDtypeStruct((rows, fold), dtype),
        grid_spec=pltpu.PrefetchScalarGridSpec(
            num_scalar_prefetch=0,
            grid=grid,
            in_specs=[
                pl.BlockSpec((tile, width), lambda i: (i, 0)),
                pl.BlockSpec((tile, width), lambda i: (i, 0)),
                # Constant block index -> fetched once, no re-DMA per step.
                pl.BlockSpec((width, fold), lambda i: (0, 0)),
            ],
            out_specs=pl.BlockSpec((tile, fold), lambda i: (i, 0)),
        ),
        compiler_params=pltpu.CompilerParams(
            dimension_semantics=("parallel",),   # rows independent -> 2 TCs on v7x
            vmem_limit_bytes=vmem_limit,
        ),
        cost_estimate=pl.CostEstimate(
            flops=2 * n * h,
            transcendentals=0,
            bytes_accessed=2 * n * h * itemsize + n * itemsize,
        ),
    )(a2, b2, sel)

    # out[r, k] is the dot product of original row r*fold + k; drop padded
    # rows and restore the PyTorch output shape (.sum(-1)).
    out_flat = out.reshape(rows * fold)[:n]
    return out_flat.reshape(orig_shape[:-1] if len(orig_shape) > 1 else ())


if __name__ == "__main__":
    key = jax.random.PRNGKey(0)

    # Primary check: shapes implied by the module (batch=8, hidden=32) ->
    # exercises the lane-folded path (fold=4).
    k1, k2 = jax.random.split(key)
    batch, hidden = 8, 32
    solutes = jax.random.normal(k1, (batch, hidden), dtype=jnp.float32)
    solvents = jax.random.normal(k2, (batch, hidden), dtype=jnp.float32)
    result = matrix_factorization(solutes, solvents)
    jax.block_until_ready(result)
    ref = jnp.sum(solutes * solvents, axis=-1)
    assert result.shape == ref.shape == (batch,)
    assert jnp.allclose(result, ref, atol=1e-5, rtol=1e-5)

    # Secondary check: wide-hidden path (fold=1, h multiple of 128).
    k3, k4 = jax.random.split(k1)
    solutes2 = jax.random.normal(k3, (64, 256), dtype=jnp.float32)
    solvents2 = jax.random.normal(k4, (64, 256), dtype=jnp.float32)
    result2 = matrix_factorization(solutes2, solvents2)
    jax.block_until_ready(result2)
    ref2 = jnp.sum(solutes2 * solvents2, axis=-1)
    assert result2.shape == ref2.shape == (64,)
    assert jnp.allclose(result2, ref2, atol=1e-4, rtol=1e-4)

    # Third check: lane folding with row padding (batch not a multiple of fold).
    k5, k6 = jax.random.split(k2)
    solutes3 = jax.random.normal(k5, (10, 32), dtype=jnp.float32)
    solvents3 = jax.random.normal(k6, (10, 32), dtype=jnp.float32)
    result3 = matrix_factorization(solutes3, solvents3)
    jax.block_until_ready(result3)
    ref3 = jnp.sum(solutes3 * solvents3, axis=-1)
    assert result3.shape == ref3.shape == (10,)
    assert jnp.allclose(result3, ref3, atol=1e-5, rtol=1e-5)

    print("KERNEL_OK")
</pallas_src>

<mosaic_0001>
module attributes {stable_mosaic.version = 11 : i64} {
  func.func @_rowdot_kernel(%arg0: i32, %arg1: memref<2x128xf32, #tpu.memory_space<vmem>>, %arg2: memref<2x128xf32, #tpu.memory_space<vmem>>, %arg3: memref<128x4xf32, #tpu.memory_space<vmem>>, %arg4: memref<2x4xf32, #tpu.memory_space<vmem>>) attributes {dimension_semantics = [#tpu.dimension_semantics<parallel>], iteration_bounds = array<i64: 1>, scalar_prefetch = 0 : i64, scratch_operands = 0 : i64, tpu.core_type = #tpu.core_type<tc>, window_params = [{transform_indices = @transform_0, window_bounds = array<i64: 2, 128>}, {transform_indices = @transform_1, window_bounds = array<i64: 2, 128>}, {pipeline_mode = #tpu.pipeline_mode<synchronous>, transform_indices = @transform_2, window_bounds = array<i64: 128, 4>}, {transform_indices = @transform_3, window_bounds = array<i64: 2, 4>}]} {
    %c0 = arith.constant 0 : index
    %c0_0 = arith.constant 0 : index
    %0 = vector.load %arg1[%c0, %c0_0] : memref<2x128xf32, #tpu.memory_space<vmem>>, vector<2x128xf32>
    %c0_1 = arith.constant 0 : index
    %c0_2 = arith.constant 0 : index
    %1 = vector.load %arg2[%c0_1, %c0_2] : memref<2x128xf32, #tpu.memory_space<vmem>>, vector<2x128xf32>
    %2 = arith.mulf %0, %1 : vector<2x128xf32>
    %c0_3 = arith.constant 0 : index
    %c0_4 = arith.constant 0 : index
    %3 = vector.load %arg3[%c0_3, %c0_4] : memref<128x4xf32, #tpu.memory_space<vmem>>, vector<128x4xf32>
    %cst = arith.constant dense<0.000000e+00> : vector<2x4xf32>
    %4 = tpu.matmul %2, %3, %cst {dimension_numbers = #tpu.dot_dimension_numbers<[1], [0], [0], [1], [0, 0, 1, 1], [], []>} : vector<2x128xf32>, vector<128x4xf32>, vector<2x4xf32> -> vector<2x4xf32>
    %c0_5 = arith.constant 0 : index
    %c0_6 = arith.constant 0 : index
    %5 = vector.load %arg4[%c0_5, %c0_6] : memref<2x4xf32, #tpu.memory_space<vmem>>, vector<2x4xf32>
    tpu.vector_store %arg4[%c0_5, %c0_6], %4 {strides = array<i32>} : memref<2x4xf32, #tpu.memory_space<vmem>>, vector<2x4xf32>,
    return
  }
  func.func @transform_0(%arg0: i32) -> (i32, i32) {
    %c0_i32 = arith.constant 0 : i32
    %c0_i32_0 = arith.constant 0 : i32
    return %arg0, %c0_i32 : i32, i32
  }
  func.func @transform_1(%arg0: i32) -> (i32, i32) {
    %c0_i32 = arith.constant 0 : i32
    %c0_i32_0 = arith.constant 0 : i32
    return %arg0, %c0_i32 : i32, i32
  }
  func.func @transform_2(%arg0: i32) -> (i32, i32) {
    %c0_i32 = arith.constant 0 : i32
    %c0_i32_0 = arith.constant 0 : i32
    %c0_i32_1 = arith.constant 0 : i32
    return %c0_i32, %c0_i32_0 : i32, i32
  }
  func.func @transform_3(%arg0: i32) -> (i32, i32) {
    %c0_i32 = arith.constant 0 : i32
    %c0_i32_0 = arith.constant 0 : i32
    return %arg0, %c0_i32 : i32, i32
  }
}

</mosaic_0001>

<bundles_post_ra>
// kernel: tpu_custom_call.1
= control target key start
LH: loop header
LB: loop body
LE: loop exit
PB: predicated region body
PF: predicated region fallthrough
CT: control target
= control target key end

     0   :  { %s177_s0 = inlined_call_operand.vmem [shape: f32[2,128], index: 0, kind: input, shape index: {}]   ;;  %s178_s1 = inlined_call_operand.vmem [shape: f32[2,128], index: 1, kind: input, shape index: {}]   ;;  %s179_s2 = inlined_call_operand.vmem [shape: f32[128,4], index: 2, kind: input, shape index: {}]   ;;  %s180_s3 = inlined_call_operand.hbm [shape: f32[2,4], index: 3, kind: output, shape index: {}]  }
   0x1   :  { %v33_v0 = vld [vmem:[%s179_s2 + $0x78] sm:$0xff]  ;;  %v32_v1 = vld [vmem:[%s179_s2 + $0x70] sm:$0xff]  ;;  %v31_v2 = vld [vmem:[%s179_s2 + $0x68] sm:$0xff] }
   0x2   :  { %34 = vmatpush.msra.mxu0 %v33_v0  ;;  %v30_v3 = vld [vmem:[%s179_s2 + $0x60] sm:$0xff]  ;;  %v29_v4 = vld [vmem:[%s179_s2 + $0x58] sm:$0xff] }
   0x4   :  { %35 = vmatpush.msra.mxu0 %v32_v1 }
   0x6   :  { %36 = vmatpush.msra.mxu0 %v31_v2 }
   0x7   :  { %8 = vsyncpa [#allocation3], 0  ;;  %v28_v5 = vld [vmem:[%s179_s2 + $0x50] sm:$0xff]  ;;  %v27_v6 = vld [vmem:[%s179_s2 + $0x48] sm:$0xff]  ;;  %s99_s21 = smov [#allocation2]   ;;  %s63_s24 = sshll.u32 %s180_s3, 4  ;;  %s64_s24 = int_to_ptr.hbm [resolvable:$true] %s63_s24 }
   0x8   :  { %37 = vmatpush.msra.mxu0 %v30_v3  ;;  %v26_v7 = vld [vmem:[%s179_s2 + $0x40] sm:$0xff]  ;;  %v25_v8 = vld [vmem:[%s179_s2 + $0x38] sm:$0xff]  ;;  %v24_v9 = vld [vmem:[%s179_s2 + $0x30] sm:$0xff]  ;;  %s61_s22 = sshll.u32 %s99_s21, 4  ;;  %vm54_vm0 = vcmask 25600   ;;  %s62_s22 = int_to_ptr.vmem [resolvable:$true] %s61_s22 }
   0x9   :  { %v23_v10 = vld [vmem:[%s179_s2 + $0x28] sm:$0xff]  ;;  %v22_v11 = vld [vmem:[%s179_s2 + $0x20] sm:$0xff]  ;;  %v21_v12 = vld [vmem:[%s179_s2 + $0x18] sm:$0xff] }
   0xa   :  { %38 = vmatpush.msra.mxu0 %v29_v4  ;;  %v20_v13 = vld [vmem:[%s179_s2 + $0x10] sm:$0xff]  ;;  %v15_v14 = vld [vmem:[%s177_s0] sm:$0x3]  ;;  %v19_v16 = vld [vmem:[%s179_s2 + $0x8] sm:$0xff] }
   0xb   :  { %v16_v15 = vld [vmem:[%s178_s1] sm:$0x3] }
   0xc   :  { %39 = vmatpush.msra.mxu0 %v28_v5  ;;  %v18_v17 = vld [vmem:[%s179_s2] sm:$0xff]  ;;  %v17_v18 = vmul.f32 %v16_v15, %v15_v14 }
   0xe   :  { %40 = vmatpush.msra.mxu0 %v27_v6 }
  0x10   :  { %41 = vmatpush.msra.mxu0 %v26_v7 }
  0x12   :  { %42 = vmatpush.msra.mxu0 %v25_v8 }
  0x14   :  { %43 = vmatpush.msra.mxu0 %v24_v9 }
  0x16   :  { %44 = vmatpush.msra.mxu0 %v23_v10 }
  0x18   :  { %45 = vmatpush.msra.mxu0 %v22_v11 }
  0x1a   :  { %46 = vmatpush.msra.mxu0 %v21_v12 }
  0x1c   :  { %47 = vmatpush.msra.mxu0 %v20_v13 }
  0x1e   :  { %48 = vmatpush.msra.mxu0 %v19_v16 }
  0x20   :  { %49 = vmatpush.msra.mxu0 %v18_v17 }
  0x21   :  { %50 = vmatmul.f32.vlgmr.msra.gmra.mxu0 %v17_v18 }
  0x9e   :  { %v51_v19 = vpop.f32.mrf.mxu0 }
  0x9f   :  { %55 = vst.msk [vmem:[#allocation2] sm:$0x3] %vm54_vm0, %v51_v19 }
  0xa0   :  { %66 = dma.vmem_to_hbm [thread:$0]  %s62_s22, 32, %s64_s24, [#allocation3]  }
  0xa1   :  { %97 = dma.done.wait [#allocation3], 32  }
  0xa2   :  { %98 = vsyncadd [#allocation3], 4294967264 }
  0xa3   :  { %71 = vsyncpa [#allocation3], 1 }

</bundles_post_ra>
